<compile_context>
chip_gen: v7x
topology: tpu7x:2x2x1
jax: 0.10.0
libtpu: 0.0.40
codegen_flags: <defaults>
</compile_context>

<pallas_src>
import functools
import math

import jax
import jax.numpy as jnp
from jax.experimental import pallas as pl
from jax.experimental.pallas import tpu as pltpu


def _round_up(v, m):
    return (v + m - 1) // m * m


def _vmem_capacity_bytes():
    """Best-effort per-core VMEM capacity; conservative (64 MiB) if unknown."""
    try:
        info = pltpu.get_tpu_info()
        cap = int(getattr(info, "vmem_capacity_bytes", 0) or 0)
        if cap > 0:
            return cap
    except Exception:
        pass
    try:
        kind = jax.devices()[0].device_kind.lower()
    except Exception:
        kind = ""
    if any(t in kind for t in ("v4", "v5", "v6")):
        return 128 << 20
    return 64 << 20  # v7x-class / unknown: be conservative


def _ffn_ln_kernel(x_ref, w1_ref, b1_ref, w2_ref, b2_ref, g_ref, beta_ref,
                   o_ref, acc_ref, *, eps, d_model, tf):
    k = pl.program_id(1)

    x = x_ref[...]                                    # (tm, d_pad), input dtype
    xm = x.astype(w1_ref.dtype)                       # MXU operand dtype

    # linear1 tile (f32 accumulation on the MXU) + bias + ReLU
    if b1_ref.shape[1] == tf:                         # weights resident (nk==1)
        b1k = b1_ref[...]
    else:                                             # slice resident full b1
        b1k = b1_ref[:, pl.ds(pl.multiple_of(k * tf, 128), tf)]
    h = jnp.dot(xm, w1_ref[0], preferred_element_type=jnp.float32)
    h = jnp.maximum(h + b1k.astype(jnp.float32), 0.0)  # (tm, tf) f32

    # linear2 partial product (f32 accumulate)
    prod = jnp.dot(h.astype(w2_ref.dtype), w2_ref[...],
                   preferred_element_type=jnp.float32)

    @pl.when(k == 0)
    def _():                                          # no zero-fill / RMW
        acc_ref[...] = prod + b2_ref[...].astype(jnp.float32)

    @pl.when(k != 0)
    def _():
        acc_ref[...] += prod

    @pl.when(k == pl.num_programs(1) - 1)
    def _():
        r = x.astype(jnp.float32) + acc_ref[...]      # residual (padded lanes 0)
        inv_d = 1.0 / d_model
        mean = jnp.sum(r, axis=-1, keepdims=True) * inv_d
        cent = r - mean
        ssq = jnp.sum(cent * cent, axis=-1, keepdims=True)
        n_extra = r.shape[-1] - d_model               # static
        if n_extra:
            # Padded lanes of r are exactly zero -> each contributes mean^2 to
            # ssq; remove analytically instead of iota/where masking.
            ssq = ssq - n_extra * (mean * mean)
        var = ssq * inv_d
        out = (cent * jax.lax.rsqrt(var + eps) * g_ref[...].astype(jnp.float32)
               + beta_ref[...].astype(jnp.float32))
        o_ref[...] = out.astype(o_ref.dtype)


def feedforward_block(x, w1, b1, w2, b2, gamma, beta, *, eps=1e-5,
                      tm=None, tf=None, mxu_dtype=jnp.bfloat16):
    """x: (..., d_model) -> (..., d_model).  Weights stored as (in, out).

    mxu_dtype: dtype of the matmul operands fed to the MXU (accumulation is
    always f32).  Default bf16 = fast path; pass None for exact native dtype.
    """
    *lead, d_model = x.shape
    d_ff = w1.shape[1]
    n = math.prod(lead) if lead else 1

    act_isz = x.dtype.itemsize
    if mxu_dtype is None:
        mxu_dtype = x.dtype
    mxu_dtype = jnp.dtype(mxu_dtype)
    if mxu_dtype.itemsize > act_isz:                  # never upcast operands
        mxu_dtype = x.dtype
    w_isz = mxu_dtype.itemsize

    # --- generation-aware budgets --------------------------------------------
    vmem_cap = _vmem_capacity_bytes()
    small_vmem = vmem_cap < (96 << 20)                # v7x-class (64 MiB / TC)
    if small_vmem:
        resident_pair_budget = 12 << 20               # W1+W2 resident threshold
        stream_pair_budget = 16 << 20                 # 2 bufs x (W1+W2 tile)
        vmem_limit_cap = 50 << 20
    else:                                             # v5e / v6e: 128 MiB VMEM
        resident_pair_budget = 44 << 20
        stream_pair_budget = 48 << 20
        vmem_limit_cap = 104 << 20

    # --- tiling / padding sizes ----------------------------------------------
    d_pad = _round_up(d_model, 128)                   # lane-dense feature dim
    f_pad128 = _round_up(d_ff, 128)

    if tf is None:
        pair_full = 2 * d_pad * f_pad128 * w_isz      # full W1+W2 (one buffer)
        if pair_full <= resident_pair_budget:
            tf = f_pad128                             # weights fully resident
        else:
            per_col = 2 * 2 * d_pad * w_isz           # dbl-buffered pair / col
            tf = max(128, min(f_pad128,
                              (stream_pair_budget // per_col) // 128 * 128))
    f_pad = _round_up(d_ff, tf)
    nk = f_pad // tf

    sub = {1: 32, 2: 16}.get(act_isz, 8)              # sublane packing per dtype
    tm_target = tm if tm is not None else (512 if nk > 1 else 256)
    if small_vmem and n >= 512:
        tm_target = min(tm_target, 256)               # >=2 row tiles for 2 TCs
    if n <= tm_target:
        tm_eff = max(sub, _round_up(n, sub))
    elif tm is None:
        tm_eff = _round_up(tm_target, 256)            # full MXU-height tiles
    else:
        tm_eff = _round_up(tm_target, sub)
    n_pad = _round_up(n, tm_eff)

    # --- operand prep (pads skipped when already aligned) ---------------------
    # TODO(synk): ragged last row tile could be handled in-kernel (clamped
    # index_map + masked store) to avoid the pad/slice activation passes.
    x2d = x.reshape(n, d_model)
    if n_pad != n or d_pad != d_model:
        x2d = jnp.pad(x2d, ((0, n_pad - n), (0, d_pad - d_model)))

    # Weight prep (cast + pad + tile-contiguous W1 layout).  Under jit with
    # static weights XLA hoists/constant-folds these one-time transforms.
    w1p = w1.astype(mxu_dtype)
    w2p = w2.astype(mxu_dtype)
    if d_pad != d_model or f_pad != d_ff:
        w1p = jnp.pad(w1p, ((0, d_pad - d_model), (0, f_pad - d_ff)))
        w2p = jnp.pad(w2p, ((0, f_pad - d_ff), (0, d_pad - d_model)))
    # (nk, d_pad, tf): each streamed W1 tile is one contiguous HBM slab.
    w1t = w1p.reshape(d_pad, nk, tf).transpose(1, 0, 2)

    def _pad_vec(v, tgt):
        v = v.astype(jnp.float32)
        if v.shape[0] != tgt:
            v = jnp.pad(v, (0, tgt - v.shape[0]))
        return v.reshape(1, tgt)

    b1p = _pad_vec(b1, f_pad)
    b2p = _pad_vec(b2, d_pad)
    gp = _pad_vec(gamma, d_pad)
    bp = _pad_vec(beta, d_pad)

    kernel = functools.partial(_ffn_ln_kernel, eps=eps, d_model=d_model, tf=tf)

    # Conservative VMEM estimate (assumes double buffering of the weights so
    # the limit also covers the non-Buffered fallback path).
    vmem_bytes = (4 * tm_eff * d_pad * act_isz            # x + out blocks
                  + 2 * 2 * d_pad * tf * w_isz            # W1 + W2 tiles
                  + 2 * (f_pad + 3 * d_pad) * 4           # b1/b2/gamma/beta
                  + tm_eff * d_pad * 4                    # f32 accumulator
                  + tm_eff * tf * (4 + w_isz)             # h (f32) + cast copy
                  + 2 * tm_eff * d_pad * 4                # LN temporaries slack
                  + (2 << 20))                            # headroom
    vmem_limit = int(min(max(vmem_bytes, 32 << 20), vmem_limit_cap))

    def build(single_buffer_resident):
        resident = pl.Buffered(1) if single_buffer_resident else None
        w_pipe = resident if nk == 1 else None        # streamed -> keep 2 bufs
        in_specs = [
            pl.BlockSpec((tm_eff, d_pad), lambda i, k: (i, 0)),                    # x
            pl.BlockSpec((1, d_pad, tf), lambda i, k: (k, 0, 0),
                         pipeline_mode=w_pipe),                                    # W1 tiles
            pl.BlockSpec((1, f_pad), lambda i, k: (0, 0), pipeline_mode=resident),  # b1 (full)
            pl.BlockSpec((tf, d_pad), lambda i, k: (k, 0), pipeline_mode=w_pipe),   # W2
            pl.BlockSpec((1, d_pad), lambda i, k: (0, 0), pipeline_mode=resident),  # b2
            pl.BlockSpec((1, d_pad), lambda i, k: (0, 0), pipeline_mode=resident),  # gamma
            pl.BlockSpec((1, d_pad), lambda i, k: (0, 0), pipeline_mode=resident),  # beta
        ]
        return pl.pallas_call(
            kernel,
            out_shape=jax.ShapeDtypeStruct((n_pad, d_pad), x.dtype),
            grid_spec=pltpu.PrefetchScalarGridSpec(
                num_scalar_prefetch=0,
                grid=(n_pad // tm_eff, nk),
                in_specs=in_specs,
                out_specs=pl.BlockSpec((tm_eff, d_pad), lambda i, k: (i, 0)),
                scratch_shapes=[pltpu.VMEM((tm_eff, d_pad), jnp.float32)],
            ),
            compiler_params=pltpu.CompilerParams(
                dimension_semantics=("parallel", "arbitrary"),
                vmem_limit_bytes=vmem_limit),
        )

    args = (x2d, w1t, b1p, w2p, b2p, gp, bp)
    try:
        out2d = build(True)(*args)
    except (TypeError, ValueError, NotImplementedError, pltpu.LoweringException):
        # Narrow fallback: only for JAX versions whose pallas_call pipeline
        # rejects pipeline_mode=pl.Buffered(1); genuine runtime failures
        # (e.g. XlaRuntimeError) propagate.  Semantics are identical.
        out2d = build(False)(*args)

    if n_pad != n or d_pad != d_model:
        out2d = out2d[:n, :d_model]
    return out2d.reshape(*lead, d_model)


def _reference(x, w1, b1, w2, b2, gamma, beta, eps=1e-5):
    h = jnp.maximum(x @ w1 + b1, 0.0)
    y = h @ w2 + b2
    r = x + y
    mean = jnp.mean(r, axis=-1, keepdims=True)
    var = jnp.mean((r - mean) ** 2, axis=-1, keepdims=True)
    return (r - mean) / jnp.sqrt(var + eps) * gamma + beta


if __name__ == "__main__":
    # Small shapes: batch=2, seq=8, d_model=32, d_feedforward=64
    batch, seq, d_model, d_ff = 2, 8, 32, 64

    key = jax.random.PRNGKey(0)
    kx, k1, kb1, k2, kb2 = jax.random.split(key, 5)

    x = jax.random.normal(kx, (batch, seq, d_model), dtype=jnp.float32)

    # Deterministic param init (PyTorch-like uniform bounds); weights stored
    # as (in, out) = transposed PyTorch layout.
    bound1 = 1.0 / (d_model ** 0.5)
    w1 = jax.random.uniform(k1, (d_model, d_ff), minval=-bound1, maxval=bound1,
                            dtype=jnp.float32)
    b1 = jax.random.uniform(kb1, (d_ff,), minval=-bound1, maxval=bound1,
                            dtype=jnp.float32)
    bound2 = 1.0 / (d_ff ** 0.5)
    w2 = jax.random.uniform(k2, (d_ff, d_model), minval=-bound2, maxval=bound2,
                            dtype=jnp.float32)
    b2 = jax.random.uniform(kb2, (d_model,), minval=-bound2, maxval=bound2,
                            dtype=jnp.float32)
    gamma = jnp.ones((d_model,), dtype=jnp.float32)   # LayerNorm weight init
    beta = jnp.zeros((d_model,), dtype=jnp.float32)   # LayerNorm bias init

    ref = _reference(x, w1, b1, w2, b2, gamma, beta)

    # Exact path: native f32 MXU operands -> matches the f32 reference tightly.
    out_exact = feedforward_block(x, w1, b1, w2, b2, gamma, beta,
                                  mxu_dtype=None)
    out_exact = jax.block_until_ready(out_exact)
    assert out_exact.shape == (batch, seq, d_model)
    assert jnp.allclose(out_exact, ref, atol=1e-5, rtol=1e-5), \
        "exact-path mismatch vs reference"

    # Fast path (default): bf16 MXU operands with f32 accumulation.
    out_fast = feedforward_block(x, w1, b1, w2, b2, gamma, beta)
    out_fast = jax.block_until_ready(out_fast)
    assert out_fast.shape == (batch, seq, d_model)
    assert jnp.allclose(out_fast, ref, atol=5e-2, rtol=5e-2), \
        "bf16-path mismatch vs reference"

    print("KERNEL_OK")
</pallas_src>

<mosaic_0001>
module attributes {stable_mosaic.version = 11 : i64} {
  func.func @_ffn_ln_kernel(%arg0: i32, %arg1: i32, %arg2: memref<16x128xf32, #tpu.memory_space<vmem>>, %arg3: memref<1x128x128xf32, #tpu.memory_space<vmem>>, %arg4: memref<1x128xf32, #tpu.memory_space<vmem>>, %arg5: memref<128x128xf32, #tpu.memory_space<vmem>>, %arg6: memref<1x128xf32, #tpu.memory_space<vmem>>, %arg7: memref<1x128xf32, #tpu.memory_space<vmem>>, %arg8: memref<1x128xf32, #tpu.memory_space<vmem>>, %arg9: memref<16x128xf32, #tpu.memory_space<vmem>>, %arg10: memref<16x128xf32, #tpu.memory_space<vmem>>) attributes {dimension_semantics = [#tpu.dimension_semantics<parallel>, #tpu.dimension_semantics<arbitrary>], iteration_bounds = array<i64: 1, 1>, scalar_prefetch = 0 : i64, scratch_operands = 1 : i64, tpu.core_type = #tpu.core_type<tc>, window_params = [{transform_indices = @transform_0, window_bounds = array<i64: 16, 128>}, {pipeline_mode = #tpu.pipeline_mode<synchronous>, transform_indices = @transform_1, window_bounds = array<i64: 1, 128, 128>}, {pipeline_mode = #tpu.pipeline_mode<synchronous>, transform_indices = @transform_2, window_bounds = array<i64: 1, 128>}, {pipeline_mode = #tpu.pipeline_mode<synchronous>, transform_indices = @transform_3, window_bounds = array<i64: 128, 128>}, {pipeline_mode = #tpu.pipeline_mode<synchronous>, transform_indices = @transform_4, window_bounds = array<i64: 1, 128>}, {pipeline_mode = #tpu.pipeline_mode<synchronous>, transform_indices = @transform_5, window_bounds = array<i64: 1, 128>}, {pipeline_mode = #tpu.pipeline_mode<synchronous>, transform_indices = @transform_6, window_bounds = array<i64: 1, 128>}, {transform_indices = @transform_7, window_bounds = array<i64: 16, 128>}]} {
    %c0 = arith.constant 0 : index
    %c0_0 = arith.constant 0 : index
    %0 = vector.load %arg2[%c0, %c0_0] : memref<16x128xf32, #tpu.memory_space<vmem>>, vector<16x128xf32>
    %c0_1 = arith.constant 0 : index
    %c0_2 = arith.constant 0 : index
    %1 = vector.load %arg4[%c0_1, %c0_2] : memref<1x128xf32, #tpu.memory_space<vmem>>, vector<1x128xf32>
    %c0_3 = arith.constant 0 : index
    %c0_4 = arith.constant 0 : index
    %c0_5 = arith.constant 0 : index
    %2 = vector.load %arg3[%c0_3, %c0_4, %c0_5] : memref<1x128x128xf32, #tpu.memory_space<vmem>>, vector<1x128x128xf32>
    %3 = vector.shape_cast %2 : vector<1x128x128xf32> to vector<128x128xf32>
    %cst = arith.constant dense<0.000000e+00> : vector<16x128xf32>
    %4 = tpu.matmul %0, %3, %cst {dimension_numbers = #tpu.dot_dimension_numbers<[1], [0], [0], [1], [0, 0, 1, 1], [], []>} : vector<16x128xf32>, vector<128x128xf32>, vector<16x128xf32> -> vector<16x128xf32>
    %5 = vector.broadcast %1 : vector<1x128xf32> to vector<16x128xf32>
    %6 = arith.addf %4, %5 : vector<16x128xf32>
    %cst_6 = arith.constant 0.000000e+00 : f32
    %7 = vector.broadcast %cst_6 : f32 to vector<16x128xf32>
    %8 = arith.maximumf %6, %7 : vector<16x128xf32>
    %c0_7 = arith.constant 0 : index
    %c0_8 = arith.constant 0 : index
    %9 = vector.load %arg5[%c0_7, %c0_8] : memref<128x128xf32, #tpu.memory_space<vmem>>, vector<128x128xf32>
    %cst_9 = arith.constant dense<0.000000e+00> : vector<16x128xf32>
    %10 = tpu.matmul %8, %9, %cst_9 {dimension_numbers = #tpu.dot_dimension_numbers<[1], [0], [0], [1], [0, 0, 1, 1], [], []>} : vector<16x128xf32>, vector<128x128xf32>, vector<16x128xf32> -> vector<16x128xf32>
    %c0_i32 = arith.constant 0 : i32
    %11 = arith.cmpi eq, %arg1, %c0_i32 : i32
    %12 = arith.extui %11 : i1 to i32
    %c0_i32_10 = arith.constant 0 : i32
    %13 = arith.cmpi ne, %12, %c0_i32_10 : i32
    scf.if %13 {
      %c0_15 = arith.constant 0 : index
      %c0_16 = arith.constant 0 : index
      %20 = vector.load %arg6[%c0_15, %c0_16] : memref<1x128xf32, #tpu.memory_space<vmem>>, vector<1x128xf32>
      %21 = vector.broadcast %20 : vector<1x128xf32> to vector<16x128xf32>
      %22 = arith.addf %10, %21 : vector<16x128xf32>
      %c0_17 = arith.constant 0 : index
      %c0_18 = arith.constant 0 : index
      %23 = vector.load %arg10[%c0_17, %c0_18] : memref<16x128xf32, #tpu.memory_space<vmem>>, vector<16x128xf32>
      tpu.vector_store %arg10[%c0_17, %c0_18], %22 {strides = array<i32>} : memref<16x128xf32, #tpu.memory_space<vmem>>, vector<16x128xf32>,
    } else {
    }
    %c0_i32_11 = arith.constant 0 : i32
    %14 = arith.cmpi ne, %arg1, %c0_i32_11 : i32
    %15 = arith.extui %14 : i1 to i32
    %c0_i32_12 = arith.constant 0 : i32
    %16 = arith.cmpi ne, %15, %c0_i32_12 : i32
    scf.if %16 {
      %c0_15 = arith.constant 0 : index
      %c0_16 = arith.constant 0 : index
      %20 = vector.load %arg10[%c0_15, %c0_16] : memref<16x128xf32, #tpu.memory_space<vmem>>, vector<16x128xf32>
      %21 = arith.addf %20, %10 : vector<16x128xf32>
      %c0_17 = arith.constant 0 : index
      %c0_18 = arith.constant 0 : index
      %22 = vector.load %arg10[%c0_17, %c0_18] : memref<16x128xf32, #tpu.memory_space<vmem>>, vector<16x128xf32>
      tpu.vector_store %arg10[%c0_17, %c0_18], %21 {strides = array<i32>} : memref<16x128xf32, #tpu.memory_space<vmem>>, vector<16x128xf32>,
    } else {
    }
    %c0_i32_13 = arith.constant 0 : i32
    %17 = arith.cmpi eq, %arg1, %c0_i32_13 : i32
    %18 = arith.extui %17 : i1 to i32
    %c0_i32_14 = arith.constant 0 : i32
    %19 = arith.cmpi ne, %18, %c0_i32_14 : i32
    scf.if %19 {
      %c0_15 = arith.constant 0 : index
      %c0_16 = arith.constant 0 : index
      %20 = vector.load %arg10[%c0_15, %c0_16] : memref<16x128xf32, #tpu.memory_space<vmem>>, vector<16x128xf32>
      %21 = arith.addf %0, %20 : vector<16x128xf32>
      %cst_17 = arith.constant dense<0.000000e+00> : vector<16xf32>
      %22 = vector.multi_reduction <add>, %21, %cst_17 [1] : vector<16x128xf32> to vector<16xf32>
      %23 = vector.shape_cast %22 : vector<16xf32> to vector<16x1xf32>
      %cst_18 = arith.constant 3.125000e-02 : f32
      %24 = vector.broadcast %cst_18 : f32 to vector<16x1xf32>
      %25 = arith.mulf %23, %24 : vector<16x1xf32>
      %26 = vector.broadcast %25 : vector<16x1xf32> to vector<16x128xf32>
      %27 = arith.subf %21, %26 : vector<16x128xf32>
      %28 = arith.mulf %27, %27 : vector<16x128xf32>
      %cst_19 = arith.constant dense<0.000000e+00> : vector<16xf32>
      %29 = vector.multi_reduction <add>, %28, %cst_19 [1] : vector<16x128xf32> to vector<16xf32>
      %30 = vector.shape_cast %29 : vector<16xf32> to vector<16x1xf32>
      %31 = arith.mulf %25, %25 : vector<16x1xf32>
      %cst_20 = arith.constant 9.600000e+01 : f32
      %32 = vector.broadcast %cst_20 : f32 to vector<16x1xf32>
      %33 = arith.mulf %32, %31 : vector<16x1xf32>
      %34 = arith.subf %30, %33 : vector<16x1xf32>
      %cst_21 = arith.constant 3.125000e-02 : f32
      %35 = vector.broadcast %cst_21 : f32 to vector<16x1xf32>
      %36 = arith.mulf %34, %35 : vector<16x1xf32>
      %cst_22 = arith.constant 9.99999974E-6 : f32
      %37 = vector.broadcast %cst_22 : f32 to vector<16x1xf32>
      %38 = arith.addf %36, %37 : vector<16x1xf32>
      %39 = math.rsqrt %38 : vector<16x1xf32>
      %40 = vector.broadcast %39 : vector<16x1xf32> to vector<16x128xf32>
      %41 = arith.mulf %27, %40 : vector<16x128xf32>
      %c0_23 = arith.constant 0 : index
      %c0_24 = arith.constant 0 : index
      %42 = vector.load %arg7[%c0_23, %c0_24] : memref<1x128xf32, #tpu.memory_space<vmem>>, vector<1x128xf32>
      %43 = vector.broadcast %42 : vector<1x128xf32> to vector<16x128xf32>
      %44 = arith.mulf %41, %43 : vector<16x128xf32>
      %c0_25 = arith.constant 0 : index
      %c0_26 = arith.constant 0 : index
      %45 = vector.load %arg8[%c0_25, %c0_26] : memref<1x128xf32, #tpu.memory_space<vmem>>, vector<1x128xf32>
      %46 = vector.broadcast %45 : vector<1x128xf32> to vector<16x128xf32>
      %47 = arith.addf %44, %46 : vector<16x128xf32>
      %c0_27 = arith.constant 0 : index
      %c0_28 = arith.constant 0 : index
      %48 = vector.load %arg9[%c0_27, %c0_28] : memref<16x128xf32, #tpu.memory_space<vmem>>, vector<16x128xf32>
      tpu.vector_store %arg9[%c0_27, %c0_28], %47 {strides = array<i32>} : memref<16x128xf32, #tpu.memory_space<vmem>>, vector<16x128xf32>,
    } else {
    }
    return
  }
  func.func @transform_0(%arg0: i32, %arg1: i32) -> (i32, i32) {
    %c0_i32 = arith.constant 0 : i32
    %c0_i32_0 = arith.constant 0 : i32
    return %arg0, %c0_i32 : i32, i32
  }
  func.func @transform_1(%arg0: i32, %arg1: i32) -> (i32, i32, i32) {
    %c0_i32 = arith.constant 0 : i32
    %c0_i32_0 = arith.constant 0 : i32
    %c0_i32_1 = arith.constant 0 : i32
    return %arg1, %c0_i32, %c0_i32_0 : i32, i32, i32
  }
  func.func @transform_2(%arg0: i32, %arg1: i32) -> (i32, i32) {
    %c0_i32 = arith.constant 0 : i32
    %c0_i32_0 = arith.constant 0 : i32
    %c0_i32_1 = arith.constant 0 : i32
    return %c0_i32, %c0_i32_0 : i32, i32
  }
  func.func @transform_3(%arg0: i32, %arg1: i32) -> (i32, i32) {
    %c0_i32 = arith.constant 0 : i32
    %c0_i32_0 = arith.constant 0 : i32
    return %arg1, %c0_i32 : i32, i32
  }
  func.func @transform_4(%arg0: i32, %arg1: i32) -> (i32, i32) {
    %c0_i32 = arith.constant 0 : i32
    %c0_i32_0 = arith.constant 0 : i32
    %c0_i32_1 = arith.constant 0 : i32
    return %c0_i32, %c0_i32_0 : i32, i32
  }
  func.func @transform_5(%arg0: i32, %arg1: i32) -> (i32, i32) {
    %c0_i32 = arith.constant 0 : i32
    %c0_i32_0 = arith.constant 0 : i32
    %c0_i32_1 = arith.constant 0 : i32
    return %c0_i32, %c0_i32_0 : i32, i32
  }
  func.func @transform_6(%arg0: i32, %arg1: i32) -> (i32, i32) {
    %c0_i32 = arith.constant 0 : i32
    %c0_i32_0 = arith.constant 0 : i32
    %c0_i32_1 = arith.constant 0 : i32
    return %c0_i32, %c0_i32_0 : i32, i32
  }
  func.func @transform_7(%arg0: i32, %arg1: i32) -> (i32, i32) {
    %c0_i32 = arith.constant 0 : i32
    %c0_i32_0 = arith.constant 0 : i32
    return %arg0, %c0_i32 : i32, i32
  }
}

</mosaic_0001>

<bundles_post_ra>
// kernel: tpu_custom_call.1
= control target key start
LH: loop header
LB: loop body
LE: loop exit
PB: predicated region body
PF: predicated region fallthrough
CT: control target
= control target key end

     0   :  { %12 = vsyncpa [#allocation4], 0  ;;  %s766_s0 = inlined_call_operand.hbm [shape: f32[16,128], index: 0, kind: input, shape index: {}]   ;;  %s767_s1 = inlined_call_operand.hbm [shape: f32[1,128,128], index: 1, kind: input, shape index: {}]   ;;  %s768_s2 = inlined_call_operand.vmem [shape: f32[1,128], index: 2, kind: input, shape index: {}]   ;;  %s769_s3 = inlined_call_operand.hbm [shape: f32[128,128], index: 3, kind: input, shape index: {}]   ;;  %s770_s4 = inlined_call_operand.vmem [shape: f32[1,128], index: 4, kind: input, shape index: {}]   ;;  %s771_s5 = inlined_call_operand.vmem [shape: f32[1,128], index: 5, kind: input, shape index: {}]   ;;  %s772_s6 = inlined_call_operand.vmem [shape: f32[1,128], index: 6, kind: input, shape index: {}]   ;;  %s773_s7 = inlined_call_operand.hbm [shape: f32[16,128], index: 7, kind: output, shape index: {}]  }
   0x1   :  { %13 = vsyncpa [#allocation7], 0 }
   0x2   :  { %14 = vsyncpa [#allocation5], 0  ;;  %s637_s24 = smov [#allocation6]   ;;  %s638_s26 = smov [#allocation3]  }
   0x3   :  { %s32_s25 = sshll.u32 %s637_s24, 4  ;;  %s20_s27 = sshll.u32 %s638_s26, 4  ;;  %s33_s25 = int_to_ptr.vmem [resolvable:$true] %s32_s25  ;;  %s683_s27 = int_to_ptr.vmem [resolvable:$true] %s20_s27 }
   0x4   :  { %s543_s30 = scalar_lea.hbm %s767_s1, 2048 }
   0x5   :  { %p544_p0 = scmp.ne.s32.totalorder %s767_s1, %s543_s30  ;;  %p547_p1 = scmp.lt.u32.totalorder %s543_s30, %s767_s1 }
   0x7   :  { %p549_p2 = pnand %p547_p1, %p544_p0 }
   0x9   :  { %552 = shalt.err (!%p549_p2)
}
   0xa   :  { %s553_s12 = scalar_lea.vmem %s33_s25, 2048  ;;  %p558_p4 = scmp.lt.s32.totalorder %s33_s25, %s33_s25 }
   0xb   :  { %p554_p3 = scmp.ne.s32.totalorder %s33_s25, %s553_s12  ;;  %p559_p5 = scmp.lt.s32.totalorder %s553_s12, %s553_s12 }
   0xd   :  { %p560_p6 = por %p559_p5, %p558_p4 }
   0xf   :  { %p561_p7 = pnand %p560_p6, %p554_p3 }
  0x11   :  { %564 = shalt.err (!%p561_p7)
}
  0x12   :  { %s639_s13 = smov 128   ;;  %s640_s14 = smov 8  }
  0x13   :  { %38 = dma.hbm_to_vmem [thread:$0]  %s767_s1, 2048, %s33_s25, [#allocation7], %s639_s13, %s639_s13, %s640_s14  }
  0x14   :  { %s565_s19 = scalar_lea.hbm %s766_s0, 256 }
  0x15   :  { %p566_p8 = scmp.ne.s32.totalorder %s766_s0, %s565_s19  ;;  %p569_p9 = scmp.lt.u32.totalorder %s565_s19, %s766_s0 }
  0x17   :  { %p571_p10 = pnand %p569_p9, %p566_p8 }
  0x19   :  { %574 = shalt.err (!%p571_p10)
}
  0x1a   :  { %s575_s24 = scalar_lea.vmem %s683_s27, 256  ;;  %p580_p12 = scmp.lt.s32.totalorder %s683_s27, %s683_s27 }
  0x1b   :  { %p576_p11 = scmp.ne.s32.totalorder %s683_s27, %s575_s24  ;;  %p581_p13 = scmp.lt.s32.totalorder %s575_s24, %s575_s24 }
  0x1d   :  { %p582_p0 = por %p581_p13, %p580_p12 }
  0x1f   :  { %p583_p1 = pnand %p582_p0, %p576_p11 }
  0x21   :  { %586 = shalt.err (!%p583_p1)
}
  0x22   :  { %26 = dma.hbm_to_vmem [thread:$0]  %s766_s0, 256, %s683_s27, [#allocation4], %s639_s13, %s639_s13, %s640_s14  }
  0x23   :  { %s641_s26 = smov [#allocation8]   ;;  %s587_s8 = scalar_lea.hbm %s769_s3, 2048 }
  0x24   :  { %s46_s28 = sshll.u32 %s641_s26, 4  ;;  %p588_p2 = scmp.ne.s32.totalorder %s769_s3, %s587_s8  ;;  %s47_s28 = int_to_ptr.vmem [resolvable:$true] %s46_s28 }
  0x25   :  { %p591_p3 = scmp.lt.u32.totalorder %s587_s8, %s769_s3 }
  0x27   :  { %p593_p4 = pnand %p591_p3, %p588_p2 }
  0x29   :  { %596 = shalt.err (!%p593_p4)
}
  0x2a   :  { %s597_s15 = scalar_lea.vmem %s47_s28, 2048  ;;  %p602_p6 = scmp.lt.s32.totalorder %s47_s28, %s47_s28 }
  0x2b   :  { %p598_p5 = scmp.ne.s32.totalorder %s47_s28, %s597_s15  ;;  %p603_p7 = scmp.lt.s32.totalorder %s597_s15, %s597_s15 }
  0x2d   :  { %p604_p8 = por %p603_p7, %p602_p6 }
  0x2f   :  { %p605_p9 = pnand %p604_p8, %p598_p5 }
  0x31   :  { %608 = shalt.err (!%p605_p9)
}
  0x32   :  { %52 = dma.hbm_to_vmem [thread:$0]  %s769_s3, 2048, %s47_s28, [#allocation7], %s639_s13, %s639_s13, %s640_s14  }
  0x33   :  { %631 = dma.done.wait [#allocation4], 256  }
  0x34   :  { %632 = vsyncadd [#allocation4], 4294967040 }
  0x35   :  { %633 = dma.done.wait [#allocation7], 4096  }
  0x36   :  { %634 = vsyncadd [#allocation7], 4294963200  ;;  %v71_v0 = vld [vmem:[#allocation6] sm:$0xff]  ;;  %v72_v1 = vld [vmem:[#allocation6 + $0x8] sm:$0xff]  ;;  %s642_s21 = smov [#allocation9]  }
  0x37   :  { %v73_v2 = vld [vmem:[#allocation6 + $0x10] sm:$0xff]  ;;  %v469_v3 = vpack.c.bf16 %v72_v1, %v71_v0  ;;  %v74_v4 = vld [vmem:[#allocation6 + $0x18] sm:$0xff]  ;;  %v75_v6 = vld [vmem:[#allocation6 + $0x20] sm:$0xff]  ;;  %s346_s22 = sshll.u32 %s642_s21, 4  ;;  %s347_s22 = int_to_ptr.vmem [resolvable:$true] %s346_s22 }
  0x38   :  { %v473_v5 = vpack.c.bf16 %v74_v4, %v73_v2  ;;  %v76_v7 = vld [vmem:[#allocation6 + $0x28] sm:$0xff]  ;;  %v77_v9 = vld [vmem:[#allocation6 + $0x30] sm:$0xff]  ;;  %v78_v10 = vld [vmem:[#allocation6 + $0x38] sm:$0xff]  ;;  %s609_s23 = scalar_lea.vmem %s347_s22, 256  ;;  %p614_p11 = scmp.lt.s32.totalorder %s347_s22, %s347_s22 }
  0x39   :  { %470 = vmatprep.subr.bf16.mxu0 %v469_v3  ;;  %v477_v8 = vpack.c.bf16 %v76_v7, %v75_v6  ;;  %v735_v11 = vld [vmem:[#allocation3] sm:$0xff]  ;;  %v170_v12 = vld [vmem:[#allocation8] sm:$0xff]  ;;  %v171_v13 = vld [vmem:[#allocation8 + $0x8] sm:$0xff]  ;;  %v481_v20 = vpack.c.bf16 %v78_v10, %v77_v9  ;;  %p610_p10 = scmp.ne.s32.totalorder %s347_s22, %s609_s23  ;;  %p615_p12 = scmp.lt.s32.totalorder %s609_s23, %s609_s23 }
  0x3a   :  { %472 = vmatpush3.bf16.msra.mxu0 %v469_v3  ;;  %431 = vmatprep.mubr.f32.mxu0 %v735_v11  ;;  %v172_v14 = vld [vmem:[#allocation8 + $0x10] sm:$0xff]  ;;  %v501_v15 = vpack.c.bf16 %v171_v13, %v170_v12  ;;  %v173_v16 = vld [vmem:[#allocation8 + $0x18] sm:$0xff]  ;;  %v174_v18 = vld [vmem:[#allocation8 + $0x20] sm:$0xff] }
  0x3b   :  { %474 = vmatprep.subr.bf16.mxu0 %v473_v5  ;;  %v505_v17 = vpack.c.bf16 %v173_v16, %v172_v14  ;;  %v175_v19 = vld [vmem:[#allocation8 + $0x28] sm:$0xff]  ;;  %v79_v21 = vld [vmem:[#allocation6 + $0x40] sm:$0xff]  ;;  %v176_v24 = vld [vmem:[#allocation8 + $0x30] sm:$0xff]  ;;  %p616_p13 = por %p615_p12, %p614_p11 }
  0x3c   :  { %502 = vmatprep.subr.bf16.mxu1 %v501_v15  ;;  %v80_v22 = vld [vmem:[#allocation6 + $0x48] sm:$0xff]  ;;  %v509_v23 = vpack.c.bf16 %v175_v19, %v174_v18  ;;  %v177_v25 = vld [vmem:[#allocation8 + $0x38] sm:$0xff]  ;;  %v81_v27 = vld [vmem:[#allocation6 + $0x50] sm:$0xff] }
  0x3d   :  { %504 = vmatpush3.bf16.msra.mxu1 %v501_v15  ;;  %v485_v26 = vpack.c.bf16 %v80_v22, %v79_v21  ;;  %v82_v28 = vld [vmem:[#allocation6 + $0x58] sm:$0xff]  ;;  %v513_v29 = vpack.c.bf16 %v177_v25, %v176_v24  ;;  %v178_v30 = vld [vmem:[#allocation8 + $0x40] sm:$0xff]  ;;  %v179_v31 = vld [vmem:[#allocation8 + $0x48] sm:$0xff]  ;;  %p617_p0 = pnand %p616_p13, %p610_p10 }
  0x3e   :  { %476 = vmatpush3.bf16.msra.mxu0 %v473_v5  ;;  %506 = vmatprep.subr.bf16.mxu1 %v505_v17  ;;  %v489_v32 = vpack.c.bf16 %v82_v28, %v81_v27  ;;  %v83_v33 = vld [vmem:[#allocation6 + $0x60] sm:$0xff]  ;;  %v84_v34 = vld [vmem:[#allocation6 + $0x68] sm:$0xff]  ;;  %v517_v35 = vpack.c.bf16 %v179_v31, %v178_v30  ;;  %v180_v36 = vld [vmem:[#allocation8 + $0x50] sm:$0xff] }
  0x3f   :  { %478 = vmatprep.subr.bf16.mxu0 %v477_v8  ;;  %v181_v37 = vld [vmem:[#allocation8 + $0x58] sm:$0xff]  ;;  %v493_v38 = vpack.c.bf16 %v84_v34, %v83_v33  ;;  %v85_v39 = vld [vmem:[#allocation6 + $0x70] sm:$0xff]  ;;  %v182_v42 = vld [vmem:[#allocation8 + $0x60] sm:$0xff] }
  0x40   :  { %v86_v40 = vld [vmem:[#allocation6 + $0x78] sm:$0xff]  ;;  %v521_v41 = vpack.c.bf16 %v181_v37, %v180_v36  ;;  %v183_v43 = vld [vmem:[#allocation8 + $0x68] sm:$0xff]  ;;  %v184_v47 = vld [vmem:[#allocation8 + $0x70] sm:$0xff] }
  0x41   :  { %508 = vmatpush3.bf16.msra.mxu1 %v505_v17  ;;  %v497_v44 = vpack.c.bf16 %v86_v40, %v85_v39  ;;  %v525_v45 = vpack.c.bf16 %v183_v43, %v182_v42  ;;  %v69_v46 = vld [vmem:[#allocation3 + $0x8] sm:$0xff]  ;;  %v359_v50 = vld [vmem:[%s768_s2] ss:$0 sm:$0xff] }
  0x42   :  { %480 = vmatpush3.bf16.msra.mxu0 %v477_v8  ;;  %510 = vmatprep.subr.bf16.mxu1 %v509_v23  ;;  %v185_v48 = vld [vmem:[#allocation8 + $0x78] sm:$0xff]  ;;  %v360_v57 = vld [vmem:[%s770_s4] ss:$0 sm:$0xff] }
  0x43   :  { %482 = vmatprep.subr.bf16.mxu0 %v481_v20  ;;  %v529_v49 = vpack.c.bf16 %v185_v48, %v184_v47  ;;  %v361_v21 = vld [vmem:[%s771_s5] ss:$0 sm:$0xff] }
  0x45   :  { %512 = vmatpush3.bf16.msra.mxu1 %v509_v23  ;;  %v362_v23 = vld [vmem:[%s772_s6] ss:$0 sm:$0xff] }
  0x46   :  { %484 = vmatpush3.bf16.msra.mxu0 %v481_v20  ;;  %514 = vmatprep.subr.bf16.mxu1 %v513_v29 }
  0x47   :  { %486 = vmatprep.subr.bf16.mxu0 %v485_v26 }
  0x49   :  { %516 = vmatpush3.bf16.msra.mxu1 %v513_v29 }
  0x4a   :  { %488 = vmatpush3.bf16.msra.mxu0 %v485_v26  ;;  %518 = vmatprep.subr.bf16.mxu1 %v517_v35 }
  0x4b   :  { %490 = vmatprep.subr.bf16.mxu0 %v489_v32 }
  0x4d   :  { %520 = vmatpush3.bf16.msra.mxu1 %v517_v35 }
  0x4e   :  { %492 = vmatpush3.bf16.msra.mxu0 %v489_v32  ;;  %522 = vmatprep.subr.bf16.mxu1 %v521_v41 }
  0x4f   :  { %494 = vmatprep.subr.bf16.mxu0 %v493_v38 }
  0x51   :  { %524 = vmatpush3.bf16.msra.mxu1 %v521_v41 }
  0x52   :  { %496 = vmatpush3.bf16.msra.mxu0 %v493_v38  ;;  %526 = vmatprep.subr.bf16.mxu1 %v525_v45 }
  0x53   :  { %498 = vmatprep.subr.bf16.mxu0 %v497_v44 }
  0x55   :  { %528 = vmatpush3.bf16.msra.mxu1 %v525_v45 }
  0x56   :  { %500 = vmatpush3.bf16.msra.mxu0 %v497_v44  ;;  %530 = vmatprep.subr.bf16.mxu1 %v529_v49 }
  0x59   :  { %432 = vmatmul.mubr.f32.vlgmr.msra.gmra.mrb[0].mxu0 %v69_v46  ;;  %532 = vmatpush3.bf16.msra.mxu1 %v529_v49 }
 0x12c   :  { %v433_v51 = vpop.f32.mrb[0].mxu0 }
 0x12d   :  { %v165_v52 = vadd.f32 %v433_v51, %v359_v50  ;;  %v159_v53 = vpop.f32.mrb[1].mxu0 }
 0x12e   :  { %v160_v54 = vadd.f32 %v359_v50, %v159_v53 }
 0x12f   :  { %v169_v56 = vmax.f32 %v165_v52, 0.0 }
 0x130   :  { %v168_v55 = vmax.f32 %v160_v54, 0.0 }
 0x132   :  { %466 = vmatprep.mubr.f32.mxu1 %v168_v55 }
 0x133   :  { %467 = vmatmul.mubr.f32.vlgmr.msra.gmra.mrb[0].mxu1 %v169_v56 }
 0x206   :  { %v468_v58 = vpop.f32.mrb[0].mxu1 }
 0x207   :  { %v252_v59 = vpop.f32.mrb[1].mxu1  ;;  %v273_v61 = vadd.f32 %v468_v58, %v360_v57 }
 0x208   :  { %v272_v60 = vadd.f32 %v360_v57, %v252_v59 }
 0x209   :  { %v292_v63 = vadd.f32 %v273_v61, %v69_v46 }
 0x20a   :  { %v291_v62 = vadd.f32 %v272_v60, %v735_v11 }
 0x20c   :  { %293 = vadd.xlane.f32.xlu0 %v291_v62 }
 0x210   :  { %295 = vadd.xlane.f32.xlu0 %v292_v63 }
 0x299   :  { %v294_v0 = vpop.xlane.xlu0 %293 }
 0x29a   :  { %v297_v1 = vmul.f32 0.03125, %v294_v0 }
 0x29c   :  { %v299_v2 = vsub.f32 %v291_v62, %v297_v1  ;;  %v307_v8 = vmul.f32 %v297_v1, %v297_v1 }
 0x29d   :  { %v296_v3 = vpop.xlane.xlu0 %295 }
 0x29e   :  { %v298_v4 = vmul.f32 0.03125, %v296_v3  ;;  %v301_v5 = vmul.f32 %v299_v2, %v299_v2  ;;  %v309_v10 = vmul.f32 96.0, %v307_v8 }
 0x2a0   :  { %v300_v6 = vsub.f32 %v292_v63, %v298_v4  ;;  %303 = vadd.xlane.f32.xlu1 %v301_v5  ;;  %v308_v9 = vmul.f32 %v298_v4, %v298_v4 }
 0x2a2   :  { %v302_v7 = vmul.f32 %v300_v6, %v300_v6  ;;  %v310_v14 = vmul.f32 96.0, %v308_v9 }
 0x2a4   :  { %305 = vadd.xlane.f32.xlu1 %v302_v7 }
 0x32d   :  { %v304_v12 = vpop.xlane.xlu1 %303 }
 0x32e   :  { %v311_v13 = vsub.f32 %v304_v12, %v309_v10 }
 0x330   :  { %v313_v11 = vmul.f32 0.03125, %v311_v13 }
 0x331   :  { %v306_v15 = vpop.xlane.xlu1 %305 }
 0x332   :  { %v315_v16 = vadd.f32 1e-05, %v313_v11  ;;  %v312_v17 = vsub.f32 %v306_v15, %v310_v14 }
 0x334   :  { %539 = vrsqrt.f32 %v315_v16  ;;  %v314_v18 = vmul.f32 0.03125, %v312_v17 }
 0x336   :  { %v316_v19 = vadd.f32 1e-05, %v314_v18 }
 0x338   :  { %541 = vrsqrt.f32 %v316_v19 }
 0x33e   :  { %v540_v20 = vpop.eup %539 }
 0x33f   :  { %v319_v22 = vmul.f32 %v540_v20, %v299_v2 }
 0x341   :  { %v328_v24 = vmul.f32 %v361_v21, %v319_v22 }
 0x342   :  { %v542_v25 = vpop.eup %541 }
 0x343   :  { %v320_v26 = vmul.f32 %v542_v25, %v300_v6  ;;  %v337_v27 = vadd.f32 %v362_v23, %v328_v24 }
 0x345   :  { %v329_v28 = vmul.f32 %v361_v21, %v320_v26  ;;  %339 = vst [vmem:[#allocation9] sm:$0xff] %v337_v27 }
 0x347   :  { %v338_v29 = vadd.f32 %v362_v23, %v329_v28 }
 0x349   :  { %340 = vst [vmem:[#allocation9 + $0x8] sm:$0xff] %v338_v29 }
 0x34a   :  { %620 = shalt.err (!%p617_p0)
}
 0x34b   :  { %s621_s24 = scalar_lea.hbm %s773_s7, 256 }
 0x34c   :  { %p622_p1 = scmp.ne.s32.totalorder %s773_s7, %s621_s24  ;;  %p625_p2 = scmp.lt.u32.totalorder %s621_s24, %s773_s7 }
 0x34e   :  { %p627_p3 = pnand %p625_p2, %p622_p1 }
 0x350   :  { %630 = shalt.err (!%p627_p3)
}
 0x351   :  { %352 = dma.vmem_to_hbm [thread:$0]  %s347_s22, 256, %s773_s7, [#allocation5], %s639_s13, %s639_s13, %s640_s14  }
 0x352   :  { %635 = dma.done.wait [#allocation5], 256  }
 0x353   :  { %636 = vsyncadd [#allocation5], 4294967040 }
 0x354   :  { %356 = vsyncpa [#allocation4], 1 }
 0x355   :  { %357 = vsyncpa [#allocation7], 1 }
 0x356   :  { %358 = vsyncpa [#allocation5], 1 }

</bundles_post_ra>
